<compile_context>
chip_gen: v5e
topology: v5e:2x2
jax: 0.10.0
libtpu: 0.0.40
codegen_flags: <defaults>
</compile_context>

<pallas_src>
import jax
import jax.numpy as jnp
from jax.experimental import pallas as pl
from jax.experimental.pallas import tpu as pltpu


def _round_up(v, m):
    return ((v + m - 1) // m) * m


def _mlp_kernel(x_ref, w1_ref, b1_ref, w2_ref, b2_ref, o_ref, h_ref):
    # fc1: [TB, I] @ [I, H], f32 accumulation on the MXU.
    h = jnp.dot(x_ref[...], w1_ref[...], preferred_element_type=jnp.float32)
    # Bias + ReLU on the VPU; stage through VMEM scratch (compute dtype) so a
    # large (TB, H) intermediate does not blow the 64-vreg register file.
    h_ref[...] = jnp.maximum(h + b1_ref[...], 0.0).astype(h_ref.dtype)
    # fc2: [TB, H] @ [H, O], f32 accumulation.
    y = jnp.dot(h_ref[...], w2_ref[...], preferred_element_type=jnp.float32)
    o_ref[...] = (y + b2_ref[...]).astype(o_ref.dtype)


def mlp_forward(x, w1, b1, w2, b2, *, block_batch=128):
    """Fused MLP forward.

    x  : [B, input_size]
    w1 : [input_size, hidden_size]   (transposed vs torch Linear.weight)
    b1 : [1, hidden_size]
    w2 : [hidden_size, output_size]
    b2 : [1, output_size]
    returns [B, output_size]
    """
    B, I = x.shape
    H = w1.shape[1]
    O = w2.shape[1]
    dtype = x.dtype
    itm = jnp.dtype(dtype).itemsize

    # Lane-dense / MXU-aligned padded extents.
    Ip = _round_up(I, 128)
    Hp = _round_up(H, 128)
    Op = _round_up(O, 128)

    # Batch tile: multiple of 8 sublanes, capped at block_batch.
    TB = min(block_batch, _round_up(B, 8))
    Bp = _round_up(B, TB)

    # Zero padding is exact: padded input/weight rows & cols contribute 0,
    # padded hidden units see bias 0 -> ReLU(0)=0 -> multiply zero w2 rows.
    x_p = jnp.pad(x, ((0, Bp - B), (0, Ip - I))) if (Bp != B or Ip != I) else x
    w1_p = jnp.pad(w1, ((0, Ip - I), (0, Hp - H))) if (Ip != I or Hp != H) else w1
    b1_p = jnp.pad(b1, ((0, 0), (0, Hp - H))) if Hp != H else b1
    w2_p = jnp.pad(w2, ((0, Hp - H), (0, Op - O))) if (Hp != H or Op != O) else w2
    b2_p = jnp.pad(b2, ((0, 0), (0, Op - O))) if Op != O else b2

    grid = (Bp // TB,)

    # VMEM budget: double-buffered x/out, resident weights+biases (counted x2
    # to stay conservative w.r.t. pipelining buffers), fc1 activation scratch.
    vmem_needed = (
        2 * TB * Ip * itm                    # x (double-buffered)
        + 2 * TB * Op * itm                  # out (double-buffered)
        + 2 * (Ip * Hp + Hp * Op) * itm      # weights
        + 2 * (Hp + Op) * itm                # biases
        + TB * Hp * itm                      # fc1 activation scratch (compute dtype)
    )
    vmem_limit = int(min(100 * 1024 * 1024,
                         max(2 * vmem_needed, 32 * 1024 * 1024)))

    cost = pl.CostEstimate(
        flops=2 * Bp * (Ip * Hp + Hp * Op),
        transcendentals=0,
        bytes_accessed=(Bp * Ip + Ip * Hp + Hp + Hp * Op + Op + Bp * Op) * itm,
    )

    out_p = pl.pallas_call(
        _mlp_kernel,
        out_shape=jax.ShapeDtypeStruct((Bp, Op), dtype),
        grid_spec=pltpu.PrefetchScalarGridSpec(
            num_scalar_prefetch=0,
            grid=grid,
            in_specs=[
                pl.BlockSpec((TB, Ip), lambda i: (i, 0)),   # x: batch-tiled
                pl.BlockSpec((Ip, Hp), lambda i: (0, 0)),   # w1: resident
                pl.BlockSpec((1, Hp), lambda i: (0, 0)),    # b1: resident
                pl.BlockSpec((Hp, Op), lambda i: (0, 0)),   # w2: resident
                pl.BlockSpec((1, Op), lambda i: (0, 0)),    # b2: resident
            ],
            out_specs=pl.BlockSpec((TB, Op), lambda i: (i, 0)),
            scratch_shapes=[pltpu.VMEM((TB, Hp), dtype)],
        ),
        compiler_params=pltpu.CompilerParams(
            dimension_semantics=("parallel",),
            vmem_limit_bytes=vmem_limit,
        ),
        cost_estimate=cost,
    )(x_p, w1_p, b1_p, w2_p, b2_p)

    return out_p[:B, :O]


def init_mlp_params(key, input_size, hidden_size, output_size, dtype=jnp.float32):
    """Deterministic init mimicking nn.Linear's U(-1/sqrt(fan_in), 1/sqrt(fan_in))."""
    k1, k2, k3, k4 = jax.random.split(key, 4)
    lim1 = 1.0 / (input_size ** 0.5)
    lim2 = 1.0 / (hidden_size ** 0.5)
    # store weights as [in, out] (transpose of torch's [out, in])
    w1 = jax.random.uniform(k1, (input_size, hidden_size), dtype, -lim1, lim1)
    b1 = jax.random.uniform(k2, (1, hidden_size), dtype, -lim1, lim1)
    w2 = jax.random.uniform(k3, (hidden_size, output_size), dtype, -lim2, lim2)
    b2 = jax.random.uniform(k4, (1, output_size), dtype, -lim2, lim2)
    return w1, b1, w2, b2


if __name__ == "__main__":
    input_size, hidden_size, output_size = 32, 64, 16
    batch = 256  # > one batch tile so the grid/pipelining path is exercised

    key = jax.random.PRNGKey(0)
    kx, kp = jax.random.split(key)
    x = jax.random.normal(kx, (batch, input_size), dtype=jnp.float32)
    w1, b1, w2, b2 = init_mlp_params(kp, input_size, hidden_size, output_size)

    out = mlp_forward(x, w1, b1, w2, b2)
    out = jax.block_until_ready(out)

    # reference check in plain JAX
    ref = jnp.maximum(x @ w1 + b1, 0.0) @ w2 + b2
    assert out.shape == (batch, output_size)
    assert jnp.allclose(out, ref, atol=1e-5, rtol=1e-5)

    print("KERNEL_OK")
</pallas_src>

<mosaic_0001>
module attributes {stable_mosaic.version = 11 : i64} {
  func.func @_mlp_kernel(%arg0: i32, %arg1: memref<128x128xf32, #tpu.memory_space<vmem>>, %arg2: memref<128x128xf32, #tpu.memory_space<vmem>>, %arg3: memref<1x128xf32, #tpu.memory_space<vmem>>, %arg4: memref<128x128xf32, #tpu.memory_space<vmem>>, %arg5: memref<1x128xf32, #tpu.memory_space<vmem>>, %arg6: memref<128x128xf32, #tpu.memory_space<vmem>>, %arg7: memref<128x128xf32, #tpu.memory_space<vmem>>) attributes {dimension_semantics = [#tpu.dimension_semantics<parallel>], iteration_bounds = array<i64: 2>, scalar_prefetch = 0 : i64, scratch_operands = 1 : i64, tpu.core_type = #tpu.core_type<tc>, window_params = [{transform_indices = @transform_0, window_bounds = array<i64: 128, 128>}, {pipeline_mode = #tpu.pipeline_mode<synchronous>, transform_indices = @transform_1, window_bounds = array<i64: 128, 128>}, {pipeline_mode = #tpu.pipeline_mode<synchronous>, transform_indices = @transform_2, window_bounds = array<i64: 1, 128>}, {pipeline_mode = #tpu.pipeline_mode<synchronous>, transform_indices = @transform_3, window_bounds = array<i64: 128, 128>}, {pipeline_mode = #tpu.pipeline_mode<synchronous>, transform_indices = @transform_4, window_bounds = array<i64: 1, 128>}, {transform_indices = @transform_5, window_bounds = array<i64: 128, 128>}]} {
    %c0 = arith.constant 0 : index
    %c0_0 = arith.constant 0 : index
    %0 = vector.load %arg1[%c0, %c0_0] : memref<128x128xf32, #tpu.memory_space<vmem>>, vector<128x128xf32>
    %c0_1 = arith.constant 0 : index
    %c0_2 = arith.constant 0 : index
    %1 = vector.load %arg2[%c0_1, %c0_2] : memref<128x128xf32, #tpu.memory_space<vmem>>, vector<128x128xf32>
    %cst = arith.constant dense<0.000000e+00> : vector<128x128xf32>
    %2 = tpu.matmul %0, %1, %cst {dimension_numbers = #tpu.dot_dimension_numbers<[1], [0], [0], [1], [0, 0, 1, 1], [], []>} : vector<128x128xf32>, vector<128x128xf32>, vector<128x128xf32> -> vector<128x128xf32>
    %c0_3 = arith.constant 0 : index
    %c0_4 = arith.constant 0 : index
    %3 = vector.load %arg3[%c0_3, %c0_4] : memref<1x128xf32, #tpu.memory_space<vmem>>, vector<1x128xf32>
    %4 = vector.broadcast %3 : vector<1x128xf32> to vector<128x128xf32>
    %5 = arith.addf %2, %4 : vector<128x128xf32>
    %cst_5 = arith.constant 0.000000e+00 : f32
    %6 = vector.broadcast %cst_5 : f32 to vector<128x128xf32>
    %7 = arith.maximumf %5, %6 : vector<128x128xf32>
    %c0_6 = arith.constant 0 : index
    %c0_7 = arith.constant 0 : index
    %8 = vector.load %arg7[%c0_6, %c0_7] : memref<128x128xf32, #tpu.memory_space<vmem>>, vector<128x128xf32>
    tpu.vector_store %arg7[%c0_6, %c0_7], %7 {strides = array<i32>} : memref<128x128xf32, #tpu.memory_space<vmem>>, vector<128x128xf32>,
    %c0_8 = arith.constant 0 : index
    %c0_9 = arith.constant 0 : index
    %9 = vector.load %arg7[%c0_8, %c0_9] : memref<128x128xf32, #tpu.memory_space<vmem>>, vector<128x128xf32>
    %c0_10 = arith.constant 0 : index
    %c0_11 = arith.constant 0 : index
    %10 = vector.load %arg4[%c0_10, %c0_11] : memref<128x128xf32, #tpu.memory_space<vmem>>, vector<128x128xf32>
    %cst_12 = arith.constant dense<0.000000e+00> : vector<128x128xf32>
    %11 = tpu.matmul %9, %10, %cst_12 {dimension_numbers = #tpu.dot_dimension_numbers<[1], [0], [0], [1], [0, 0, 1, 1], [], []>} : vector<128x128xf32>, vector<128x128xf32>, vector<128x128xf32> -> vector<128x128xf32>
    %c0_13 = arith.constant 0 : index
    %c0_14 = arith.constant 0 : index
    %12 = vector.load %arg5[%c0_13, %c0_14] : memref<1x128xf32, #tpu.memory_space<vmem>>, vector<1x128xf32>
    %13 = vector.broadcast %12 : vector<1x128xf32> to vector<128x128xf32>
    %14 = arith.addf %11, %13 : vector<128x128xf32>
    %c0_15 = arith.constant 0 : index
    %c0_16 = arith.constant 0 : index
    %15 = vector.load %arg6[%c0_15, %c0_16] : memref<128x128xf32, #tpu.memory_space<vmem>>, vector<128x128xf32>
    tpu.vector_store %arg6[%c0_15, %c0_16], %14 {strides = array<i32>} : memref<128x128xf32, #tpu.memory_space<vmem>>, vector<128x128xf32>,
    return
  }
  func.func @transform_0(%arg0: i32) -> (i32, i32) {
    %c0_i32 = arith.constant 0 : i32
    %c0_i32_0 = arith.constant 0 : i32
    return %arg0, %c0_i32 : i32, i32
  }
  func.func @transform_1(%arg0: i32) -> (i32, i32) {
    %c0_i32 = arith.constant 0 : i32
    %c0_i32_0 = arith.constant 0 : i32
    %c0_i32_1 = arith.constant 0 : i32
    return %c0_i32, %c0_i32_0 : i32, i32
  }
  func.func @transform_2(%arg0: i32) -> (i32, i32) {
    %c0_i32 = arith.constant 0 : i32
    %c0_i32_0 = arith.constant 0 : i32
    %c0_i32_1 = arith.constant 0 : i32
    return %c0_i32, %c0_i32_0 : i32, i32
  }
  func.func @transform_3(%arg0: i32) -> (i32, i32) {
    %c0_i32 = arith.constant 0 : i32
    %c0_i32_0 = arith.constant 0 : i32
    %c0_i32_1 = arith.constant 0 : i32
    return %c0_i32, %c0_i32_0 : i32, i32
  }
  func.func @transform_4(%arg0: i32) -> (i32, i32) {
    %c0_i32 = arith.constant 0 : i32
    %c0_i32_0 = arith.constant 0 : i32
    %c0_i32_1 = arith.constant 0 : i32
    return %c0_i32, %c0_i32_0 : i32, i32
  }
  func.func @transform_5(%arg0: i32) -> (i32, i32) {
    %c0_i32 = arith.constant 0 : i32
    %c0_i32_0 = arith.constant 0 : i32
    return %arg0, %c0_i32 : i32, i32
  }
}

</mosaic_0001>

<bundles_post_ra>
// kernel: tpu_custom_call.1
= control target key start
LH: loop header
LB: loop body
LE: loop exit
PB: predicated region body
PF: predicated region fallthrough
CT: control target
= control target key end

     0   :  { %10 = vsyncpa [#allocation4], 0  ;;  %s1158_s0 = inlined_call_operand.hbm [shape: f32[256,128], index: 0, kind: input, shape index: {}]   ;;  %s1159_s1 = inlined_call_operand.hbm [shape: f32[128,128], index: 1, kind: input, shape index: {}]   ;;  %s1160_s2 = inlined_call_operand.vmem [shape: f32[1,128], index: 2, kind: input, shape index: {}]   ;;  %s1161_s3 = inlined_call_operand.hbm [shape: f32[128,128], index: 3, kind: input, shape index: {}]   ;;  %s1162_s4 = inlined_call_operand.vmem [shape: f32[1,128], index: 4, kind: input, shape index: {}]   ;;  %s1163_s5 = inlined_call_operand.hbm [shape: f32[256,128], index: 5, kind: output, shape index: {}]  }
   0x1   :  { %12 = vsyncpa [#allocation4 + $0x1], 0 }
   0x2   :  { %13 = vsyncpa [#allocation7], 0 }
   0x3   :  { %14 = vsyncpa [#allocation5], 0 }
   0x4   :  { %16 = vsyncpa [#allocation5 + $0x1], 0  ;;  %s961_s18 = smov 0   ;;  %s963_s19 = smov 0  }
   0x5   :  { %s965_s20 = smov 0   ;;  %s967_s21 = smov 0  }
   0x6 LB: > { %s982_s22 = sadd.s32 4294967295, %s923_s21   ;;  %s638_s23 = sadd.s32 4294967294, %s923_s21   ;;  %s923_s21 = sphi %s967_s21, %s1175_s21   ;;  %s919_s20 = sphi %s965_s20, %s1174_s20   ;;  %s915_s19 = sphi %s963_s19, %s1173_s19   ;;  %s911_s18 = sphi %s961_s18, %s1172_s18  }
   0x7   : > { %p42_p0 = scmp.ne.s32.totalorder %s915_s19, %s911_s18  ;;  %p43_p1 = scmp.eq.s32.totalorder %s982_s22, 0 }
   0x8   : > { %p150_p2 = scmp.eq.s32.totalorder %s982_s22, 1  ;;  %p156_p3 = scmp.eq.s32.totalorder %s638_s23, 1 }
   0x9   : > { %p991_p4 = por %p43_p1, %p42_p0  ;;  %p639_p5 = scmp.ge.s32.totalorder %s923_s21, 1 }
   0xa   : > { %p996_p6 = por %p156_p3, %p42_p0  ;;  %p163_p7 = scmp.lt.s32.totalorder %s923_s21, 3 }
   0xb   : > { %s174_s28 = sshll.u32 %s1159_s1, 4  ;;  %s925_s30 = smov [#allocation6]   ;;  %s175_s28 = int_to_ptr.hbm [resolvable:$true] %s174_s28 }
   0xc   : > { %p1004_p8 = pnand %p639_p5, %p163_p7  ;;  %s176_s6 = sshll.u32 %s925_s30, 4  ;;  %s177_s6 = int_to_ptr.vmem [resolvable:$true] %s176_s6 }
   0xd   : > { %s191_s9 = sshll.u32 %s1161_s3, 4  ;;  %s1164_s10 = smov 128   ;;  %s192_s9 = int_to_ptr.hbm [resolvable:$true] %s191_s9 }
   0xe   : > { %p702_p9 = pneg %p1004_p8  ;;  %s927_s11 = smov 8  }
   0xf   : > { %s928_s12 = smov [#allocation8]   ;;  %s1023_s14 = sadd.s32 1, %s923_s21  }
  0x10   : > { %p703_p10 = pnand %p702_p9, %p43_p1  ;;  %s193_s13 = sshll.u32 %s928_s12, 4  ;;  %s194_s13 = int_to_ptr.vmem [resolvable:$true] %s193_s13 }
  0x11   : > { %s29_s15 = sadd.s32 1, %s919_s20  ;;  %s26_s16 = ssub.s32 %s923_s21, %s1023_s14 }
  0x12   : > { %705 = dma.hbm_to_vmem [thread:$0]  (!%p703_p10), %s175_s28, 2048, %s177_s6, [#allocation7], %s1164_s10, %s1164_s10, %s927_s11  }
  0x13   : > { %708 = dma.hbm_to_vmem [thread:$0]  (!%p703_p10), %s192_s9, 2048, %s194_s13, [#allocation7], %s1164_s10, %s1164_s10, %s927_s11  }
  0x14   : > { %p36_p12 = scmp.ne.s32.totalorder %s919_s20, %s915_s19  ;;  %p27_p13 = scmp.eq.s32.totalorder %s26_s16, 0 }
  0x15   : > { %p37_p0 = scmp.eq.s32.totalorder %s923_s21, 0  ;;  %p719_p5 = scmp.lt.s32.totalorder %s923_s21, 2 }
  0x16   : > { %p1033_p3 = por %p150_p2, %p36_p12  ;;  %s210_s26 = sand.u32 1, %s919_s20  }
  0x17   : > { %s1039_s23 = scalar_select %p27_p13, %s919_s20, %s29_s15  }
  0x18   : > { %p38_p7 = por %p37_p0, %p36_p12  ;;  %s643_s27 = sshll.u32 %s210_s26, 7 }
  0x19   : > { %s656_s28 = sshll.u32 %s923_s21, 7  ;;  %s214_s8 = scalar_lea.vmem [#allocation3], %s643_s27 }
  0x1a   : > { %s219_s7 = scalar_lea.hbm %s1158_s0, %s656_s28  ;;  %s222_s9 = sshll.u32 %s214_s8, 4  ;;  %s223_s9 = int_to_ptr.vmem [resolvable:$true] %s222_s9 }
  0x1b   : > { %s220_s12 = sshll.u32 %s219_s7, 4  ;;  %p1046_p2 = pnand %p719_p5, %p38_p7  ;;  %s221_s12 = int_to_ptr.hbm [resolvable:$true] %s220_s12 }
  0x1c   : > { %s211_s15 = scalar_lea.sflag [#allocation4], %s210_s26  ;;  %s823_s16 = sshra.s32 %s221_s12, 4  ;;  %s824_s16 = int_to_ptr.hbm [resolvable:$true] %s823_s16 }
  0x1d   : > { %s825_s10 = scalar_lea.hbm %s824_s16, 128  ;;  %p827_p10 = pneg %p1046_p2 }
  0x1e   : > { %p826_p9 = scmp.ne.s32.totalorder %s824_s16, %s825_s10  ;;  %s830_s30 = scalar_lea.hbm %s1158_s0, 256 }
  0x1f   : > { %p831_p0 = scmp.lt.s32.totalorder %s824_s16, %s1158_s0  ;;  %p832_p5 = scmp.lt.s32.totalorder %s830_s30, %s825_s10 }
  0x20   : > { %p828_p12 = pnand %p827_p10, %p826_p9 }
  0x21   : > { %p833_p7 = por %p832_p5, %p831_p0 }
  0x22   : > { %p829_p13 = pneg %p828_p12 }
  0x24   : > { %p834_p11 = pnand %p833_p7, %p829_p13 }
  0x26   : > { %837 = shalt.err (!%p834_p11)
}
  0x27   : > { %s1170_s26 = smov 128   ;;  %234 = sbr.rel (%p1004_p8) target bundleno = 409 (0x199), region = 40 }
  0x28   : > { %712 = dma.hbm_to_vmem [thread:$0]  (!%p1046_p2), %s221_s12, 2048, %s223_s9, %s211_s15, %s1170_s26, %s1170_s26, %s927_s11  }
  0x29   : > { %s1066_s8 = sand.u32 (!%p1004_p8), 1, %s915_s19  }
  0x2a   : > { %s647_s10 = sshll.u32 (!%p1004_p8), %s1066_s8, 7  ;;  %s237_s16 = scalar_lea.sflag (!%p1004_p8), [#allocation4], %s1066_s8 }
  0x2b   : > { %s1072_s28 = scalar_lea.vmem (!%p1004_p8), [#allocation3], %s647_s10 }
  0x2c   : > { %898 = dma.done.wait (%p991_p4), %s237_s16, 2048  }
  0x2d   : > { %900 = vsyncadd (%p991_p4), %s237_s16, 4294965248 }
  0x2e   : > { %902 = dma.done.wait (%p43_p1), [#allocation7], 4096  }
  0x2f   : > { %904 = vsyncadd (%p43_p1), [#allocation7], 4294963200  ;;  %v311_v0 = vld [vmem:[#allocation6 + $0x78] sm:$0xff]  ;;  %v310_v1 = vld [vmem:[#allocation6 + $0x70] sm:$0xff]  ;;  %s1106_s12 = scalar_lea.vmem [#allocation9], %s647_s10  ;;  %s657_s13 = sshll.u32 %s982_s22, 7 }
  0x30   : > { %658 = vmatpush.msra.mxu2 %v311_v0  ;;  %316 = vmatpush.msra.mxu0 %v311_v0  ;;  %v309_v2 = vld [vmem:[#allocation6 + $0x68] sm:$0xff]  ;;  %v308_v3 = vld [vmem:[#allocation6 + $0x60] sm:$0xff]  ;;  %v307_v4 = vld [vmem:[#allocation6 + $0x58] sm:$0xff]  ;;  %s542_s30 = scalar_lea.hbm %s1163_s5, %s657_s13  ;;  %s543_s6 = sshll.u32 %s1106_s12, 4  ;;  %s544_s6 = int_to_ptr.vmem [resolvable:$true] %s543_s6 }
  0x31   : > { %v306_v5 = vld [vmem:[#allocation6 + $0x50] sm:$0xff]  ;;  %v305_v6 = vld [vmem:[#allocation6 + $0x48] sm:$0xff]  ;;  %v304_v7 = vld [vmem:[#allocation6 + $0x40] sm:$0xff]  ;;  %s545_s7 = sshll.u32 %s542_s30, 4  ;;  %s531_s26 = scalar_lea.sflag [#allocation5], %s1066_s8  ;;  %s546_s7 = int_to_ptr.hbm [resolvable:$true] %s545_s7 }
  0x32   : > { %659 = vmatpush.msra.mxu2 %v310_v1  ;;  %317 = vmatpush.msra.mxu0 %v310_v1  ;;  %v303_v8 = vld [vmem:[#allocation6 + $0x38] sm:$0xff]  ;;  %v302_v9 = vld [vmem:[#allocation6 + $0x30] sm:$0xff]  ;;  %v301_v10 = vld [vmem:[#allocation6 + $0x28] sm:$0xff]  ;;  %s867_s10 = sshra.s32 %s546_s7, 4  ;;  %s873_s24 = scalar_lea.hbm %s1163_s5, 256  ;;  %s868_s10 = int_to_ptr.hbm [resolvable:$true] %s867_s10 }
  0x33   : > { %v300_v11 = vld [vmem:[#allocation6 + $0x20] sm:$0xff]  ;;  %v299_v12 = vld [vmem:[#allocation6 + $0x18] sm:$0xff]  ;;  %v298_v13 = vld [vmem:[#allocation6 + $0x10] sm:$0xff]  ;;  %s869_s16 = scalar_lea.hbm %s868_s10, 128  ;;  %p874_p11 = scmp.lt.s32.totalorder %s868_s10, %s1163_s5 }
  0x34   : > { %660 = vmatpush.msra.mxu2 %v309_v2  ;;  %318 = vmatpush.msra.mxu0 %v309_v2  ;;  %v297_v14 = vld [vmem:[#allocation6 + $0x8] sm:$0xff]  ;;  %v296_v15 = vld [vmem:[#allocation6] sm:$0xff]  ;;  %v290_v20 = vld [vmem:[%s1072_s28 + $0x50] sm:$0xff]  ;;  %p870_p1 = scmp.ne.s32.totalorder %s868_s10, %s869_s16  ;;  %p875_p2 = scmp.lt.s32.totalorder %s873_s24, %s869_s16 }
  0x35   : > { %v288_v16 = vld [vmem:[%s1072_s28 + $0x40] sm:$0xff]  ;;  %v289_v18 = vld [vmem:[%s1072_s28 + $0x48] sm:$0xff]  ;;  %v282_v21 = vld [vmem:[%s1072_s28 + $0x10] sm:$0xff] }
  0x36   : > { %661 = vmatpush.msra.mxu2 %v308_v3  ;;  %319 = vmatpush.msra.mxu0 %v308_v3  ;;  %v280_v17 = vld [vmem:[%s1072_s28] sm:$0xff]  ;;  %v281_v19 = vld [vmem:[%s1072_s28 + $0x8] sm:$0xff]  ;;  %v291_v22 = vld [vmem:[%s1072_s28 + $0x58] sm:$0xff]  ;;  %p871_p4 = pnand %p870_p1, %p1033_p3  ;;  %p876_p9 = por %p875_p2, %p874_p11 }
  0x37   : > { %v283_v23 = vld [vmem:[%s1072_s28 + $0x18] sm:$0xff]  ;;  %v443_v25 = vld [vmem:[#allocation8 + $0x70] sm:$0xff]  ;;  %v442_v26 = vld [vmem:[#allocation8 + $0x68] sm:$0xff] }
  0x38   : > { %662 = vmatpush.msra.mxu2 %v307_v4  ;;  %320 = vmatpush.msra.mxu0 %v307_v4  ;;  %v444_v24 = vld [vmem:[#allocation8 + $0x78] sm:$0xff]  ;;  %v441_v27 = vld [vmem:[#allocation8 + $0x60] sm:$0xff]  ;;  %v439_v31 = vld [vmem:[#allocation8 + $0x50] sm:$0xff]  ;;  %p872_p8 = pneg %p871_p4 }
  0x39   : > { %674 = vmatpush.msra.mxu3 %v444_v24  ;;  %449 = vmatpush.msra.mxu1 %v444_v24  ;;  %v292_v28 = vld [vmem:[%s1072_s28 + $0x60] sm:$0xff]  ;;  %v440_v30 = vld [vmem:[#allocation8 + $0x58] sm:$0xff]  ;;  %v438_v32 = vld [vmem:[#allocation8 + $0x48] sm:$0xff] }
  0x3a   : > { %663 = vmatpush.msra.mxu2 %v306_v5  ;;  %321 = vmatpush.msra.mxu0 %v306_v5  ;;  %v284_v29 = vld [vmem:[%s1072_s28 + $0x20] sm:$0xff]  ;;  %v293_v34 = vld [vmem:[%s1072_s28 + $0x68] sm:$0xff]  ;;  %v436_v36 = vld [vmem:[#allocation8 + $0x38] sm:$0xff]  ;;  %p877_p10 = pnand %p876_p9, %p872_p8 }
  0x3b   : > { %675 = vmatpush.msra.mxu3 %v443_v25  ;;  %450 = vmatpush.msra.mxu1 %v443_v25  ;;  %v437_v33 = vld [vmem:[#allocation8 + $0x40] sm:$0xff]  ;;  %v285_v35 = vld [vmem:[%s1072_s28 + $0x28] sm:$0xff]  ;;  %v435_v37 = vld [vmem:[#allocation8 + $0x30] sm:$0xff] }
  0x3c   : > { %664 = vmatpush.msra.mxu2 %v305_v6  ;;  %322 = vmatpush.msra.mxu0 %v305_v6  ;;  %v434_v38 = vld [vmem:[#allocation8 + $0x28] sm:$0xff]  ;;  %v433_v39 = vld [vmem:[#allocation8 + $0x20] sm:$0xff]  ;;  %v294_v40 = vld [vmem:[%s1072_s28 + $0x70] sm:$0xff] }
  0x3d   : > { %676 = vmatpush.msra.mxu3 %v442_v26  ;;  %451 = vmatpush.msra.mxu1 %v442_v26  ;;  %v286_v41 = vld [vmem:[%s1072_s28 + $0x30] sm:$0xff]  ;;  %v432_v42 = vld [vmem:[#allocation8 + $0x18] sm:$0xff]  ;;  %v430_v46 = vld [vmem:[#allocation8 + $0x8] sm:$0xff] }
  0x3e   : > { %665 = vmatpush.msra.mxu2 %v304_v7  ;;  %323 = vmatpush.msra.mxu0 %v304_v7  ;;  %v295_v43 = vld [vmem:[%s1072_s28 + $0x78] sm:$0xff]  ;;  %v431_v45 = vld [vmem:[#allocation8 + $0x10] sm:$0xff]  ;;  %v429_v47 = vld [vmem:[#allocation8] sm:$0xff] }
  0x3f   : > { %677 = vmatpush.msra.mxu3 %v441_v27  ;;  %452 = vmatpush.msra.mxu1 %v441_v27  ;;  %v287_v44 = vld [vmem:[%s1072_s28 + $0x38] sm:$0xff]  ;;  %v761_v48 = vld [vmem:[%s1160_s2] ss:$0 sm:$0xff] }
  0x40   : > { %666 = vmatpush.msra.mxu2 %v303_v8  ;;  %324 = vmatpush.msra.mxu0 %v303_v8 }
  0x41   : > { %678 = vmatpush.msra.mxu3 %v440_v30  ;;  %453 = vmatpush.msra.mxu1 %v440_v30 }
  0x42   : > { %667 = vmatpush.msra.mxu2 %v302_v9  ;;  %325 = vmatpush.msra.mxu0 %v302_v9 }
  0x43   : > { %679 = vmatpush.msra.mxu3 %v439_v31  ;;  %454 = vmatpush.msra.mxu1 %v439_v31 }
  0x44   : > { %668 = vmatpush.msra.mxu2 %v301_v10  ;;  %326 = vmatpush.msra.mxu0 %v301_v10 }
  0x45   : > { %680 = vmatpush.msra.mxu3 %v438_v32  ;;  %455 = vmatpush.msra.mxu1 %v438_v32 }
  0x46   : > { %669 = vmatpush.msra.mxu2 %v300_v11  ;;  %327 = vmatpush.msra.mxu0 %v300_v11 }
  0x47   : > { %681 = vmatpush.msra.mxu3 %v437_v33  ;;  %456 = vmatpush.msra.mxu1 %v437_v33  ;;  %v762_v33 = vld [vmem:[%s1162_s4] ss:$0 sm:$0xff] }
  0x48   : > { %670 = vmatpush.msra.mxu2 %v299_v12  ;;  %328 = vmatpush.msra.mxu0 %v299_v12 }
  0x49   : > { %682 = vmatpush.msra.mxu3 %v436_v36  ;;  %457 = vmatpush.msra.mxu1 %v436_v36 }
  0x4a   : > { %671 = vmatpush.msra.mxu2 %v298_v13  ;;  %329 = vmatpush.msra.mxu0 %v298_v13 }
  0x4b   : > { %683 = vmatpush.msra.mxu3 %v435_v37  ;;  %458 = vmatpush.msra.mxu1 %v435_v37 }
  0x4c   : > { %672 = vmatpush.msra.mxu2 %v297_v14  ;;  %330 = vmatpush.msra.mxu0 %v297_v14 }
  0x4d   : > { %684 = vmatpush.msra.mxu3 %v434_v38  ;;  %459 = vmatpush.msra.mxu1 %v434_v38 }
  0x4e   : > { %673 = vmatpush.msra.mxu2 %v296_v15  ;;  %331 = vmatpush.msra.mxu0 %v296_v15 }
  0x4f   : > { %356 = vmatmul.f32.vlgmr.msra.gmra.mxu2 %v288_v16  ;;  %332 = vmatmul.f32.vlgmr.msra.gmra.mxu0 %v280_v17 }
  0x50   : > { %685 = vmatpush.msra.mxu3 %v433_v39  ;;  %460 = vmatpush.msra.mxu1 %v433_v39 }
  0x52   : > { %686 = vmatpush.msra.mxu3 %v432_v42  ;;  %461 = vmatpush.msra.mxu1 %v432_v42 }
  0x54   : > { %687 = vmatpush.msra.mxu3 %v431_v45  ;;  %462 = vmatpush.msra.mxu1 %v431_v45 }
  0x56   : > { %688 = vmatpush.msra.mxu3 %v430_v46  ;;  %463 = vmatpush.msra.mxu1 %v430_v46 }
  0x57   : > { %359 = vmatmul.f32.gmra.mxu2 %v289_v18  ;;  %335 = vmatmul.f32.gmra.mxu0 %v281_v19 }
  0x58   : > { %689 = vmatpush.msra.mxu3 %v429_v47  ;;  %464 = vmatpush.msra.mxu1 %v429_v47 }
  0x5f   : > { %362 = vmatmul.f32.gmra.mxu2 %v290_v20  ;;  %338 = vmatmul.f32.gmra.mxu0 %v282_v21 }
  0x67   : > { %365 = vmatmul.f32.gmra.mxu2 %v291_v22  ;;  %341 = vmatmul.f32.gmra.mxu0 %v283_v23 }
  0x6f   : > { %368 = vmatmul.f32.gmra.mxu2 %v292_v28  ;;  %344 = vmatmul.f32.gmra.mxu0 %v284_v29 }
  0x77   : > { %371 = vmatmul.f32.gmra.mxu2 %v293_v34  ;;  %347 = vmatmul.f32.gmra.mxu0 %v285_v35 }
  0x7f   : > { %374 = vmatmul.f32.gmra.mxu2 %v294_v40  ;;  %350 = vmatmul.f32.gmra.mxu0 %v286_v41 }
  0x87   : > { %377 = vmatmul.f32.gmra.mxu2 %v295_v43  ;;  %353 = vmatmul.f32.gmra.mxu0 %v287_v44 }
  0xcc   : > { %v333_v49 = vpop.f32.mrf.mxu0 }
  0xcd   : > { %v334_v50 = vadd.f32 %v761_v48, %v333_v49 }
  0xcf   : > { %v381_v51 = vmax.f32 %v334_v50, 0.0 }
  0xd1   : > { %465 = vmatmul.f32.vlgmr.msra.gmra.mxu1 %v381_v51 }
  0xd2   : > { %v357_v52 = vpop.f32.mrf.mxu2 }
  0xd3   : > { %v358_v53 = vadd.f32 %v761_v48, %v357_v52 }
  0xd4   : > { %v336_v54 = vpop.f32.mrf.mxu0 }
  0xd5   : > { %v389_v55 = vmax.f32 %v358_v53, 0.0  ;;  %v337_v56 = vadd.f32 %v761_v48, %v336_v54 }
  0xd7   : > { %489 = vmatmul.f32.vlgmr.msra.gmra.mxu3 %v389_v55  ;;  %v382_v57 = vmax.f32 %v337_v56, 0.0 }
  0xd9   : > { %468 = vmatmul.f32.gmra.mxu1 %v382_v57 }
  0xda   : > { %v360_v58 = vpop.f32.mrf.mxu2 }
  0xdb   : > { %v361_v59 = vadd.f32 %v761_v48, %v360_v58 }
  0xdc   : > { %v339_v60 = vpop.f32.mrf.mxu0 }
  0xdd   : > { %v390_v61 = vmax.f32 %v361_v59, 0.0  ;;  %v340_v62 = vadd.f32 %v761_v48, %v339_v60 }
  0xdf   : > { %492 = vmatmul.f32.gmra.mxu3 %v390_v61  ;;  %v383_v63 = vmax.f32 %v340_v62, 0.0 }
  0xe1   : > { %471 = vmatmul.f32.gmra.mxu1 %v383_v63 }
  0xe2   : > { %v363_v0 = vpop.f32.mrf.mxu2 }
  0xe3   : > { %v364_v1 = vadd.f32 %v761_v48, %v363_v0 }
  0xe4   : > { %v342_v2 = vpop.f32.mrf.mxu0 }
  0xe5   : > { %v391_v3 = vmax.f32 %v364_v1, 0.0  ;;  %v343_v4 = vadd.f32 %v761_v48, %v342_v2 }
  0xe7   : > { %495 = vmatmul.f32.gmra.mxu3 %v391_v3  ;;  %v384_v5 = vmax.f32 %v343_v4, 0.0 }
  0xe9   : > { %474 = vmatmul.f32.gmra.mxu1 %v384_v5 }
  0xea   : > { %v366_v6 = vpop.f32.mrf.mxu2 }
  0xeb   : > { %v367_v7 = vadd.f32 %v761_v48, %v366_v6 }
  0xec   : > { %v345_v8 = vpop.f32.mrf.mxu0 }
  0xed   : > { %v392_v9 = vmax.f32 %v367_v7, 0.0  ;;  %v346_v10 = vadd.f32 %v761_v48, %v345_v8 }
  0xef   : > { %498 = vmatmul.f32.gmra.mxu3 %v392_v9  ;;  %v385_v11 = vmax.f32 %v346_v10, 0.0 }
  0xf1   : > { %477 = vmatmul.f32.gmra.mxu1 %v385_v11 }
  0xf2   : > { %v369_v12 = vpop.f32.mrf.mxu2 }
  0xf3   : > { %v370_v13 = vadd.f32 %v761_v48, %v369_v12 }
  0xf4   : > { %v348_v14 = vpop.f32.mrf.mxu0 }
  0xf5   : > { %v393_v15 = vmax.f32 %v370_v13, 0.0  ;;  %v349_v16 = vadd.f32 %v761_v48, %v348_v14 }
  0xf7   : > { %501 = vmatmul.f32.gmra.mxu3 %v393_v15  ;;  %v386_v17 = vmax.f32 %v349_v16, 0.0 }
  0xf9   : > { %480 = vmatmul.f32.gmra.mxu1 %v386_v17 }
  0xfa   : > { %v372_v18 = vpop.f32.mrf.mxu2 }
  0xfb   : > { %v373_v19 = vadd.f32 %v761_v48, %v372_v18 }
  0xfc   : > { %v351_v20 = vpop.f32.mrf.mxu0 }
  0xfd   : > { %v394_v21 = vmax.f32 %v373_v19, 0.0  ;;  %v352_v22 = vadd.f32 %v761_v48, %v351_v20 }
  0xff   : > { %504 = vmatmul.f32.gmra.mxu3 %v394_v21  ;;  %v387_v23 = vmax.f32 %v352_v22, 0.0 }
 0x101   : > { %483 = vmatmul.f32.gmra.mxu1 %v387_v23 }
 0x102   : > { %v375_v24 = vpop.f32.mrf.mxu2 }
 0x103   : > { %v376_v25 = vadd.f32 %v761_v48, %v375_v24 }
 0x104   : > { %v354_v26 = vpop.f32.mrf.mxu0 }
 0x105   : > { %v395_v27 = vmax.f32 %v376_v25, 0.0  ;;  %v355_v28 = vadd.f32 %v761_v48, %v354_v26 }
 0x107   : > { %507 = vmatmul.f32.gmra.mxu3 %v395_v27  ;;  %v388_v29 = vmax.f32 %v355_v28, 0.0 }
 0x109   : > { %486 = vmatmul.f32.gmra.mxu1 %v388_v29 }
 0x10a   : > { %v378_v30 = vpop.f32.mrf.mxu2 }
 0x10b   : > { %v379_v31 = vadd.f32 %v761_v48, %v378_v30 }
 0x10d   : > { %v396_v32 = vmax.f32 %v379_v31, 0.0 }
 0x10f   : > { %510 = vmatmul.f32.gmra.mxu3 %v396_v32 }
 0x14e   : > { %v466_v34 = vpop.f32.mrf.mxu1 }
 0x14f   : > { %v467_v35 = vadd.f32 %v762_v33, %v466_v34 }
 0x151   : > { %514 = vst [vmem:[%s1106_s12] sm:$0xff] %v467_v35 }
 0x156   : > { %v469_v36 = vpop.f32.mrf.mxu1 }
 0x157   : > { %v470_v37 = vadd.f32 %v762_v33, %v469_v36 }
 0x159   : > { %515 = vst [vmem:[%s1106_s12 + $0x8] sm:$0xff] %v470_v37 }
 0x15a   : > { %v490_v38 = vpop.f32.mrf.mxu3 }
 0x15b   : > { %v491_v39 = vadd.f32 %v762_v33, %v490_v38 }
 0x15d   : > { %522 = vst [vmem:[%s1106_s12 + $0x40] sm:$0xff] %v491_v39 }
 0x15e   : > { %v472_v40 = vpop.f32.mrf.mxu1 }
 0x15f   : > { %v473_v41 = vadd.f32 %v762_v33, %v472_v40 }
 0x161   : > { %516 = vst [vmem:[%s1106_s12 + $0x10] sm:$0xff] %v473_v41 }
 0x162   : > { %v493_v42 = vpop.f32.mrf.mxu3 }
 0x163   : > { %v494_v43 = vadd.f32 %v762_v33, %v493_v42 }
 0x165   : > { %523 = vst [vmem:[%s1106_s12 + $0x48] sm:$0xff] %v494_v43 }
 0x166   : > { %v475_v44 = vpop.f32.mrf.mxu1 }
 0x167   : > { %v476_v45 = vadd.f32 %v762_v33, %v475_v44 }
 0x169   : > { %517 = vst [vmem:[%s1106_s12 + $0x18] sm:$0xff] %v476_v45 }
 0x16a   : > { %v496_v46 = vpop.f32.mrf.mxu3 }
 0x16b   : > { %v497_v47 = vadd.f32 %v762_v33, %v496_v46 }
 0x16d   : > { %524 = vst [vmem:[%s1106_s12 + $0x50] sm:$0xff] %v497_v47 }
 0x16e   : > { %v478_v48 = vpop.f32.mrf.mxu1 }
 0x16f   : > { %v479_v49 = vadd.f32 %v762_v33, %v478_v48 }
 0x171   : > { %518 = vst [vmem:[%s1106_s12 + $0x20] sm:$0xff] %v479_v49 }
 0x172   : > { %v499_v50 = vpop.f32.mrf.mxu3 }
 0x173   : > { %v500_v51 = vadd.f32 %v762_v33, %v499_v50 }
 0x175   : > { %525 = vst [vmem:[%s1106_s12 + $0x58] sm:$0xff] %v500_v51 }
 0x176   : > { %v481_v52 = vpop.f32.mrf.mxu1 }
 0x177   : > { %v482_v53 = vadd.f32 %v762_v33, %v481_v52 }
 0x179   : > { %519 = vst [vmem:[%s1106_s12 + $0x28] sm:$0xff] %v482_v53 }
 0x17a   : > { %v502_v54 = vpop.f32.mrf.mxu3 }
 0x17b   : > { %v503_v55 = vadd.f32 %v762_v33, %v502_v54 }
 0x17d   : > { %526 = vst [vmem:[%s1106_s12 + $0x60] sm:$0xff] %v503_v55 }
 0x17e   : > { %v484_v56 = vpop.f32.mrf.mxu1 }
 0x17f   : > { %v485_v57 = vadd.f32 %v762_v33, %v484_v56 }
 0x181   : > { %520 = vst [vmem:[%s1106_s12 + $0x30] sm:$0xff] %v485_v57 }
 0x182   : > { %v505_v58 = vpop.f32.mrf.mxu3 }
 0x183   : > { %v506_v59 = vadd.f32 %v762_v33, %v505_v58 }
 0x185   : > { %527 = vst [vmem:[%s1106_s12 + $0x68] sm:$0xff] %v506_v59 }
 0x186   : > { %v487_v60 = vpop.f32.mrf.mxu1 }
 0x187   : > { %v488_v61 = vadd.f32 %v762_v33, %v487_v60 }
 0x189   : > { %521 = vst [vmem:[%s1106_s12 + $0x38] sm:$0xff] %v488_v61 }
 0x18a   : > { %v508_v62 = vpop.f32.mrf.mxu3 }
 0x18b   : > { %v509_v63 = vadd.f32 %v762_v33, %v508_v62 }
 0x18d   : > { %528 = vst [vmem:[%s1106_s12 + $0x70] sm:$0xff] %v509_v63 }
 0x192   : > { %v511_v0 = vpop.f32.mrf.mxu3 }
 0x193   : > { %v512_v1 = vadd.f32 %v762_v33, %v511_v0 }
 0x195   : > { %529 = vst [vmem:[%s1106_s12 + $0x78] sm:$0xff] %v512_v1 }
 0x196   : > { %880 = shalt.err (!%p877_p10)
}
 0x197   : > { %s929_s8 = smov 128   ;;  %s930_s9 = smov 8  }
 0x198   : > { %700 = dma.vmem_to_hbm [thread:$0]  (%p1033_p3), %s544_s6, 2048, %s546_s7, %s531_s26, %s929_s8, %s929_s8, %s930_s9  }
 0x199 PF: > { %s560_s12 = sand.u32 1, %s911_s18   ;;  %p1171_p12 = scmp.ge.s32.totalorder %s923_s21, 2 }
 0x19a   : > { %s561_s13 = scalar_lea.sflag [#allocation5], %s560_s12 }
 0x19b   : > { %p714_p13 = pnand %p1171_p12, %p996_p6 }
 0x19d   : > { %p715_p0 = pneg %p714_p13 }
 0x19f   : > { %906 = dma.done.wait (%p715_p0), %s561_s13, 2048  }
 0x1a0   : > { %908 = vsyncadd (%p715_p0), %s561_s13, 4294965248  ;;  %p19_p5 = scmp.ge.s32.totalorder %s1023_s14, 4   ;;  %s1172_s18 = smov %s915_s19 }
 0x1a1   : > { %s1173_s19 = smov %s919_s20  ;;  %s1174_s20 = smov %s1039_s23 }
 0x1a2   : > { %s1175_s21 = smov %s1023_s14  ;;  %21 = sbr.rel (!%p19_p5) target bundleno = 6 (0x6), region = 93 }
 0x1a7   :  { %567 = vsyncpa [#allocation4], 1 }
 0x1a8   :  { %569 = vsyncpa [#allocation4 + $0x1], 1 }
 0x1a9   :  { %570 = vsyncpa [#allocation7], 1 }
 0x1aa   :  { %571 = vsyncpa [#allocation5], 1 }
 0x1ab   :  { %573 = vsyncpa [#allocation5 + $0x1], 1 }

</bundles_post_ra>
